<compile_context>
chip_gen: v7x
topology: tpu7x:2x2x1
jax: 0.10.0
libtpu: 0.0.40
codegen_flags: <defaults>
</compile_context>

<pallas_src>
import functools

import jax
import jax.numpy as jnp
from jax.experimental import pallas as pl
from jax.experimental.pallas import tpu as pltpu


# ---------------------------------------------------------------------------
# small helpers
# ---------------------------------------------------------------------------
def _apply_act(x, act):
    if act == "relu":
        return jnp.maximum(x, 0.0)
    if act == "hardswish":
        return x * jnp.clip(x + 3.0, 0.0, 6.0) * (1.0 / 6.0)
    if act == "hardsigmoid":
        return jnp.clip(x + 3.0, 0.0, 6.0) * (1.0 / 6.0)
    if act == "sigmoid":
        return jax.nn.sigmoid(x)
    return x


_TILE_CANDIDATES = (512, 256, 128, 64, 32, 16, 8)


def _pick_tile(m, cap=512):
    """Largest tile <= cap that divides m (falls back to the full extent)."""
    for t in _TILE_CANDIDATES:
        if t <= cap and m % t == 0:
            return t
    return m


# ---------------------------------------------------------------------------
# generic tiled matmul (stem im2col + bilinear-resize matrices)
# ---------------------------------------------------------------------------
def _mm_kernel(x_ref, w_ref, b_ref, o_ref, *, act, cast_bf16):
    x = x_ref[...]
    w = w_ref[...]
    if cast_bf16:
        x = x.astype(jnp.bfloat16)
        w = w.astype(jnp.bfloat16)
    acc = jnp.dot(x, w, preferred_element_type=jnp.float32)
    acc = acc + b_ref[...]
    o_ref[...] = _apply_act(acc, act)


def matmul_bias_act(x2d, w, b, act="none", cast_bf16=True, tile_cap=512):
    """(M, K) @ (K, Cout) + b with fused activation."""
    M, K = x2d.shape
    Cout = w.shape[1]
    Mp = ((M + 7) // 8) * 8
    if Mp != M:                       # only hits odd row counts (not in this net)
        x2d = jnp.pad(x2d, ((0, Mp - M), (0, 0)))
    tile_m = _pick_tile(Mp, tile_cap)
    b2d = b.reshape(1, Cout)
    out = pl.pallas_call(
        functools.partial(_mm_kernel, act=act, cast_bf16=cast_bf16),
        out_shape=jax.ShapeDtypeStruct((Mp, Cout), jnp.float32),
        grid_spec=pltpu.PrefetchScalarGridSpec(
            num_scalar_prefetch=0,
            grid=(Mp // tile_m,),
            in_specs=[
                pl.BlockSpec((tile_m, K), lambda i: (i, 0)),
                pl.BlockSpec((K, Cout), lambda i: (0, 0)),
                pl.BlockSpec((1, Cout), lambda i: (0, 0)),
            ],
            out_specs=pl.BlockSpec((tile_m, Cout), lambda i: (i, 0)),
        ),
        compiler_params=pltpu.CompilerParams(
            dimension_semantics=("parallel",)),
    )(x2d, w, b2d)
    return out[:M] if Mp != M else out


# ---------------------------------------------------------------------------
# fused 1x1 conv: y = act((x [* scale]) @ W + b) [+ residual]
# ---------------------------------------------------------------------------
def fused_pointwise(x, w, b, act, scale=None, residual=None, tile_cap=512):
    """Pointwise conv in NHWC with optional per-(batch, channel) input gate
    (SE excite / ASPP gating) and optional residual add fused in."""
    N, H, W, Cin = x.shape
    Cout = w.shape[1]
    M = H * W
    tile = _pick_tile(M, tile_cap)
    x3 = x.reshape(N, M, Cin)
    has_scale = scale is not None
    has_res = residual is not None

    inputs = [x3, w, b.reshape(1, Cout)]
    in_specs = [
        pl.BlockSpec((1, tile, Cin), lambda n, i: (n, i, 0)),
        pl.BlockSpec((Cin, Cout), lambda n, i: (0, 0)),
        pl.BlockSpec((1, Cout), lambda n, i: (0, 0)),
    ]
    if has_scale:
        inputs.append(scale.reshape(N, 1, Cin))
        in_specs.append(pl.BlockSpec((1, 1, Cin), lambda n, i: (n, 0, 0)))
    if has_res:
        inputs.append(residual.reshape(N, M, Cout))
        in_specs.append(pl.BlockSpec((1, tile, Cout), lambda n, i: (n, i, 0)))

    def kernel(*refs):
        x_ref, w_ref, b_ref = refs[:3]
        idx = 3
        s_ref = None
        r_ref = None
        if has_scale:
            s_ref = refs[idx]; idx += 1
        if has_res:
            r_ref = refs[idx]; idx += 1
        o_ref = refs[idx]
        xv = x_ref[0]                                  # (tile, Cin) f32
        if has_scale:
            xv = xv * s_ref[0]                         # (1, Cin) broadcast gate
        acc = jnp.dot(xv.astype(jnp.bfloat16),
                      w_ref[...].astype(jnp.bfloat16),
                      preferred_element_type=jnp.float32)
        acc = acc + b_ref[...]
        acc = _apply_act(acc, act)
        if has_res:
            acc = acc + r_ref[0]
        o_ref[0] = acc

    out = pl.pallas_call(
        kernel,
        out_shape=jax.ShapeDtypeStruct((N, M, Cout), jnp.float32),
        grid_spec=pltpu.PrefetchScalarGridSpec(
            num_scalar_prefetch=0,
            grid=(N, M // tile),
            in_specs=in_specs,
            out_specs=pl.BlockSpec((1, tile, Cout), lambda n, i: (n, i, 0)),
        ),
        compiler_params=pltpu.CompilerParams(
            dimension_semantics=("parallel", "parallel")),
    )(*inputs)
    return out.reshape(N, H, W, Cout)


# ---------------------------------------------------------------------------
# depthwise KxK conv (groups == channels), NHWC
# ---------------------------------------------------------------------------
def _dw_s1_kernel(x_ref, w_ref, b_ref, o_ref, *, ksize, dil, act):
    _, ho, wo, C = o_ref.shape
    acc = jnp.zeros((1, ho, wo, C), jnp.float32)
    for kh in range(ksize):
        for kw in range(ksize):
            patch = x_ref[:, kh * dil:kh * dil + ho, kw * dil:kw * dil + wo, :]
            acc = acc + patch * w_ref[kh, kw]          # w_ref[kh, kw] -> (1, C)
    acc = acc + b_ref[...]
    o_ref[...] = _apply_act(acc, act)


def _dw_s2_kernel(p00, p01, p10, p11, w_ref, b_ref, o_ref, *, ksize, act):
    # stride-2 conv expressed over even/odd row/column phases of the padded
    # input: tap (kh, kw) reads phase (kh%2, kw%2) at offset (kh//2, kw//2),
    # so the kernel computes exactly the strided output (no dense-then-slice).
    _, ho, wo, C = o_ref.shape
    phases = ((p00, p01), (p10, p11))
    acc = jnp.zeros((1, ho, wo, C), jnp.float32)
    for kh in range(ksize):
        for kw in range(ksize):
            pref = phases[kh % 2][kw % 2]
            r0, c0 = kh // 2, kw // 2
            acc = acc + pref[:, r0:r0 + ho, c0:c0 + wo, :] * w_ref[kh, kw]
    acc = acc + b_ref[...]
    o_ref[...] = _apply_act(acc, act)


def depthwise_conv(x, w, b, *, stride, dilation, act):
    N, H, W, C = x.shape
    K = w.shape[0]
    pad = (K - 1) // 2 * dilation
    xp = jnp.pad(x, ((0, 0), (pad, pad), (pad, pad), (0, 0)))
    Hp, Wp = H + 2 * pad, W + 2 * pad
    w4 = w.reshape(K, K, 1, C)
    b2 = b.reshape(1, C)

    # TODO(synk): tile over H (halo = dilation*(K-1) rows) for large inputs so
    # the accumulator stays in vregs and v7x's 64 MiB VMEM is respected.
    if stride == 1:
        ho, wo = Hp - dilation * (K - 1), Wp - dilation * (K - 1)
        return pl.pallas_call(
            functools.partial(_dw_s1_kernel, ksize=K, dil=dilation, act=act),
            out_shape=jax.ShapeDtypeStruct((N, ho, wo, C), jnp.float32),
            grid_spec=pltpu.PrefetchScalarGridSpec(
                num_scalar_prefetch=0,
                grid=(N,),
                in_specs=[
                    pl.BlockSpec((1, Hp, Wp, C), lambda n: (n, 0, 0, 0)),
                    pl.BlockSpec((K, K, 1, C), lambda n: (0, 0, 0, 0)),
                    pl.BlockSpec((1, C), lambda n: (0, 0)),
                ],
                out_specs=pl.BlockSpec((1, ho, wo, C), lambda n: (n, 0, 0, 0)),
            ),
            compiler_params=pltpu.CompilerParams(
                dimension_semantics=("parallel",)),
        )(xp, w4, b2)

    assert stride == 2 and dilation == 1
    ho, wo = H // 2, W // 2
    phases = [xp[:, a::2, c::2, :] for a in (0, 1) for c in (0, 1)]
    ph_shape = phases[0].shape                          # all four are identical
    phase_spec = pl.BlockSpec((1,) + ph_shape[1:], lambda n: (n, 0, 0, 0))
    return pl.pallas_call(
        functools.partial(_dw_s2_kernel, ksize=K, act=act),
        out_shape=jax.ShapeDtypeStruct((N, ho, wo, C), jnp.float32),
        grid_spec=pltpu.PrefetchScalarGridSpec(
            num_scalar_prefetch=0,
            grid=(N,),
            in_specs=[phase_spec, phase_spec, phase_spec, phase_spec,
                      pl.BlockSpec((K, K, 1, C), lambda n: (0, 0, 0, 0)),
                      pl.BlockSpec((1, C), lambda n: (0, 0))],
            out_specs=pl.BlockSpec((1, ho, wo, C), lambda n: (n, 0, 0, 0)),
        ),
        compiler_params=pltpu.CompilerParams(
            dimension_semantics=("parallel",)),
    )(*phases, w4, b2)


# ---------------------------------------------------------------------------
# fused global-average-pool + fc chain (SE squeeze/excite, ASPP scale branch)
# ---------------------------------------------------------------------------
def gap_fc_chain(x, layers):
    """x: (N,H,W,C); layers: [(w, b, act), ...].  Returns (N, Cout_last)."""
    N, H, W, C = x.shape
    Cout = layers[-1][0].shape[1]
    acts = tuple(a for (_w, _b, a) in layers)
    inv_hw = 1.0 / float(H * W)
    nl = len(layers)

    inputs = [x]
    in_specs = [pl.BlockSpec((1, H, W, C), lambda n: (n, 0, 0, 0))]
    for (w, bb, _a) in layers:
        cin, cout = w.shape
        inputs += [w, bb.reshape(1, cout)]
        in_specs += [pl.BlockSpec((cin, cout), lambda n: (0, 0)),
                     pl.BlockSpec((1, cout), lambda n: (0, 0))]

    def kernel(*refs):
        x_ref = refs[0]
        o_ref = refs[-1]
        v = x_ref[...]                            # (1, H, W, C)
        s = jnp.sum(v, axis=2)
        s = jnp.sum(s, axis=1) * inv_hw           # (1, C) mean
        s = jnp.broadcast_to(s, (8, C))           # 8 identical rows -> clean MXU
        for li in range(nl):
            w_ref = refs[1 + 2 * li]
            b_ref = refs[2 + 2 * li]
            s = jnp.dot(s.astype(jnp.bfloat16), w_ref[...].astype(jnp.bfloat16),
                        preferred_element_type=jnp.float32)
            s = _apply_act(s + b_ref[...], acts[li])
        o_ref[0] = s[0:1, :]

    out = pl.pallas_call(
        kernel,
        out_shape=jax.ShapeDtypeStruct((N, 1, Cout), jnp.float32),
        grid_spec=pltpu.PrefetchScalarGridSpec(
            num_scalar_prefetch=0,
            grid=(N,),
            in_specs=in_specs,
            out_specs=pl.BlockSpec((1, 1, Cout), lambda n: (n, 0, 0)),
        ),
        compiler_params=pltpu.CompilerParams(
            dimension_semantics=("parallel",)),
    )(*inputs)
    return out.reshape(N, Cout)


# ---------------------------------------------------------------------------
# stem conv + bilinear resize wrappers
# ---------------------------------------------------------------------------
def conv3x3_s2(x, w, b, act):
    """Stem conv: 3x3, stride 2, pad 1 via (27-wide) im2col + Pallas matmul."""
    # TODO(synk): fuse the im2col into the kernel (9 shifted MXU taps) to avoid
    # the small 27-wide HBM intermediate.
    N, H, W, Cin = x.shape
    Cout = w.shape[-1]
    xp = jnp.pad(x, ((0, 0), (1, 1), (1, 1), (0, 0)))
    Ho, Wo = H // 2, W // 2
    cols = []
    for kh in range(3):
        for kw in range(3):
            cols.append(xp[:, kh:kh + 2 * Ho:2, kw:kw + 2 * Wo:2, :])
    col = jnp.concatenate(cols, axis=-1)                # (N,Ho,Wo,9*Cin)
    w2 = w.reshape(9 * Cin, Cout)
    y = matmul_bias_act(col.reshape(N * Ho * Wo, 9 * Cin), w2, b, act)
    return y.reshape(N, Ho, Wo, Cout)


def _interp_matrix(out_size, in_size):
    """PyTorch bilinear, align_corners=False (half-pixel, clamped)."""
    i = jnp.arange(out_size, dtype=jnp.float32)
    src = jnp.maximum((i + 0.5) * (in_size / out_size) - 0.5, 0.0)
    i0 = jnp.clip(jnp.floor(src), 0, in_size - 1).astype(jnp.int32)
    i1 = jnp.minimum(i0 + 1, in_size - 1)
    lam = src - i0.astype(jnp.float32)
    rows = jnp.arange(out_size)
    A = jnp.zeros((out_size, in_size), jnp.float32)
    A = A.at[rows, i0].add(1.0 - lam)
    A = A.at[rows, i1].add(lam)
    return A


def resize_bilinear(x, oh, ow):
    """Separable bilinear resize as two Pallas matmuls (f32 precision)."""
    N, H, W, C = x.shape
    if (oh, ow) == (H, W):
        return x
    Ah = _interp_matrix(oh, H)
    Aw = _interp_matrix(ow, W)
    t = jnp.transpose(x, (1, 0, 2, 3)).reshape(H, N * W * C)
    y = matmul_bias_act(Ah, t, jnp.zeros((N * W * C,), jnp.float32), "none",
                        cast_bf16=False)
    y = y.reshape(oh, N, W, C).transpose(1, 0, 2, 3)
    t = jnp.transpose(y, (2, 0, 1, 3)).reshape(W, N * oh * C)
    z = matmul_bias_act(Aw, t, jnp.zeros((N * oh * C,), jnp.float32), "none",
                        cast_bf16=False)
    z = z.reshape(ow, N, oh, C).transpose(1, 2, 0, 3)
    return z


# ---------------------------------------------------------------------------
# MobileNetV3-Large (dilated) + LR-ASPP configuration & parameters
# ---------------------------------------------------------------------------
# (cin, kernel, expanded, cout, use_se, act, stride, dilation)
_MBV3_LARGE_DILATED = [
    (16, 3, 16, 16, False, "relu", 1, 1),
    (16, 3, 64, 24, False, "relu", 2, 1),
    (24, 3, 72, 24, False, "relu", 1, 1),
    (24, 5, 72, 40, True, "relu", 2, 1),       # features[4] -> "low" (stride 8)
    (40, 5, 120, 40, True, "relu", 1, 1),
    (40, 5, 120, 40, True, "relu", 1, 1),
    (40, 3, 240, 80, False, "hardswish", 2, 1),
    (80, 3, 200, 80, False, "hardswish", 1, 1),
    (80, 3, 184, 80, False, "hardswish", 1, 1),
    (80, 3, 184, 80, False, "hardswish", 1, 1),
    (80, 3, 480, 112, True, "hardswish", 1, 1),
    (112, 3, 672, 112, True, "hardswish", 1, 1),
    (112, 5, 672, 160, True, "hardswish", 2, 2),   # dilated: stride forced to 1
    (160, 5, 960, 160, True, "hardswish", 1, 2),
    (160, 5, 960, 160, True, "hardswish", 1, 2),
]

_NUM_CLASSES = 21
_PKEY = jax.random.PRNGKey(0)
_PCOUNT = [0]


def _randn(shape, scale):
    _PCOUNT[0] += 1
    k = jax.random.fold_in(_PKEY, _PCOUNT[0])
    return jax.random.normal(k, shape, jnp.float32) * scale


def _make_divisible(v, divisor=8, min_value=None):
    if min_value is None:
        min_value = divisor
    new_v = max(min_value, int(v + divisor / 2) // divisor * divisor)
    if new_v < 0.9 * v:
        new_v += divisor
    return new_v


def _conv_bn_params(cin, cout, k=1):
    fan_in = cin * k * k
    w = _randn((k, k, cin, cout), (2.0 / fan_in) ** 0.5)
    gamma = 1.0 + _randn((cout,), 0.1)
    beta = _randn((cout,), 0.1)
    scale = gamma / jnp.sqrt(1.0 + 1e-5)
    return w * scale, beta


def _dwconv_bn_params(c, k):
    w = _randn((k, k, c), (2.0 / (k * k)) ** 0.5)
    gamma = 1.0 + _randn((c,), 0.1)
    beta = _randn((c,), 0.1)
    scale = gamma / jnp.sqrt(1.0 + 1e-5)
    return w * scale, beta


def _conv_params(cin, cout):
    w = _randn((cin, cout), (2.0 / cin) ** 0.5)
    b = _randn((cout,), 0.05)
    return w, b


def init_params():
    bf16 = jnp.bfloat16
    params = {}
    w, b = _conv_bn_params(3, 16, 3)
    params["stem"] = {"w": w, "b": b}                       # features[0]
    blocks = []
    for (cin, k, exp, cout, use_se, _act, _s, _d) in _MBV3_LARGE_DILATED:
        p = {}
        if exp != cin:
            w, b = _conv_bn_params(cin, exp, 1)
            p["exp_w"], p["exp_b"] = w.reshape(cin, exp).astype(bf16), b
        w, b = _dwconv_bn_params(exp, k)
        p["dw_w"], p["dw_b"] = w, b                          # depthwise stays f32 (VPU)
        if use_se:
            sq = _make_divisible(exp // 4, 8)
            f1w, f1b = _conv_params(exp, sq)
            f2w, f2b = _conv_params(sq, exp)
            p["se"] = {"fc1_w": f1w.astype(bf16), "fc1_b": f1b,
                       "fc2_w": f2w.astype(bf16), "fc2_b": f2b}
        w, b = _conv_bn_params(exp, cout, 1)
        p["proj_w"], p["proj_b"] = w.reshape(exp, cout).astype(bf16), b
        blocks.append(p)
    params["blocks"] = blocks
    w, b = _conv_bn_params(160, 960, 1)                     # features[16]
    params["last"] = {"w": w.reshape(160, 960).astype(bf16), "b": b}
    # LR-ASPP head (low=40ch, high=960ch, inter=128, classes=21)
    w, b = _conv_bn_params(960, 128, 1)
    params["cbr"] = {"w": w.reshape(960, 128).astype(bf16), "b": b}
    params["scale"] = {"w": _randn((960, 128), (2.0 / 960) ** 0.5).astype(bf16),
                       "b": jnp.zeros((128,), jnp.float32)}
    lw, lb = _conv_params(40, _NUM_CLASSES)
    hw, hb = _conv_params(128, _NUM_CLASSES)
    params["low_cls"] = {"w": lw.astype(bf16), "b": lb}
    params["high_cls"] = {"w": hw.astype(bf16), "b": hb}
    return params


# ---------------------------------------------------------------------------
# Forward pass
# ---------------------------------------------------------------------------
def inverted_residual(x, cfg, p):
    cin, k, exp, cout, use_se, act, stride, dil = cfg
    y = x
    if exp != cin:
        y = fused_pointwise(y, p["exp_w"], p["exp_b"], act)
    real_stride = 1 if dil > 1 else stride
    y = depthwise_conv(y, p["dw_w"], p["dw_b"],
                       stride=real_stride, dilation=dil, act=act)
    se_scale = None
    if use_se:
        se_scale = gap_fc_chain(
            y, [(p["se"]["fc1_w"], p["se"]["fc1_b"], "relu"),
                (p["se"]["fc2_w"], p["se"]["fc2_b"], "hardsigmoid")])
    residual = x if (stride == 1 and cin == cout) else None
    # SE channel gate and residual add are fused into the projection matmul.
    return fused_pointwise(y, p["proj_w"], p["proj_b"], "none",
                           scale=se_scale, residual=residual)


def lraspp_forward(params, x_nchw):
    x = jnp.transpose(x_nchw, (0, 2, 3, 1)).astype(jnp.float32)  # NCHW -> NHWC
    N, H, W, _ = x.shape

    # --- MobileNetV3-Large (dilated) backbone -----------------------------
    y = conv3x3_s2(x, params["stem"]["w"], params["stem"]["b"], "hardswish")
    low = None
    for idx, (cfg, p) in enumerate(zip(_MBV3_LARGE_DILATED, params["blocks"]),
                                   start=1):
        y = inverted_residual(y, cfg, p)
        if idx == 4:                       # features[4] output, 40ch @ stride 8
            low = y
    high = fused_pointwise(y, params["last"]["w"], params["last"]["b"], "hardswish")

    # --- LR-ASPP head ------------------------------------------------------
    # ASPP gate fused into the 21-class high classifier, which is applied
    # BEFORE the bilinear upsample (1x1 conv and bilinear resize commute), so
    # the resizes only move 21 channels.  The low/high sum is fused into the
    # low classifier as its residual input.
    xh = fused_pointwise(high, params["cbr"]["w"], params["cbr"]["b"], "relu")
    s = gap_fc_chain(high, [(params["scale"]["w"], params["scale"]["b"], "sigmoid")])
    out_high = fused_pointwise(xh, params["high_cls"]["w"], params["high_cls"]["b"],
                               "none", scale=s)
    out_high = resize_bilinear(out_high, low.shape[1], low.shape[2])
    out = fused_pointwise(low, params["low_cls"]["w"], params["low_cls"]["b"],
                          "none", residual=out_high)
    out = resize_bilinear(out, H, W)
    out = jnp.transpose(out, (0, 3, 1, 2))                        # back to NCHW
    # torchvision returns OrderedDict(out=...); LR_ASPP wraps it as {'output': ...}
    return {"output": {"out": out}}


if __name__ == "__main__":
    params = init_params()
    key = jax.random.PRNGKey(0)
    x = jax.random.normal(key, (2, 3, 64, 64), jnp.float32)       # NCHW input
    result = lraspp_forward(params, x)
    out = jax.block_until_ready(result["output"]["out"])
    assert out.shape == (2, _NUM_CLASSES, 64, 64)
    assert bool(jnp.all(jnp.isfinite(out)))
    print("KERNEL_OK")
</pallas_src>

<mosaic_0001>
module attributes {stable_mosaic.version = 11 : i64} {
  func.func @_mm_kernel(%arg0: i32, %arg1: memref<512x27xf32, #tpu.memory_space<vmem>>, %arg2: memref<27x16xf32, #tpu.memory_space<vmem>>, %arg3: memref<1x16xf32, #tpu.memory_space<vmem>>, %arg4: memref<512x16xf32, #tpu.memory_space<vmem>>) attributes {dimension_semantics = [#tpu.dimension_semantics<parallel>], iteration_bounds = array<i64: 4>, scalar_prefetch = 0 : i64, scratch_operands = 0 : i64, tpu.core_type = #tpu.core_type<tc>, window_params = [{transform_indices = @transform_0, window_bounds = array<i64: 512, 27>}, {pipeline_mode = #tpu.pipeline_mode<synchronous>, transform_indices = @transform_1, window_bounds = array<i64: 27, 16>}, {pipeline_mode = #tpu.pipeline_mode<synchronous>, transform_indices = @transform_2, window_bounds = array<i64: 1, 16>}, {transform_indices = @transform_3, window_bounds = array<i64: 512, 16>}]} {
    %c0 = arith.constant 0 : index
    %c0_0 = arith.constant 0 : index
    %0 = vector.load %arg1[%c0, %c0_0] : memref<512x27xf32, #tpu.memory_space<vmem>>, vector<512x27xf32>
    %c0_1 = arith.constant 0 : index
    %c0_2 = arith.constant 0 : index
    %1 = vector.load %arg2[%c0_1, %c0_2] : memref<27x16xf32, #tpu.memory_space<vmem>>, vector<27x16xf32>
    %2 = arith.truncf %0 : vector<512x27xf32> to vector<512x27xbf16>
    %3 = arith.truncf %1 : vector<27x16xf32> to vector<27x16xbf16>
    %cst = arith.constant dense<0.000000e+00> : vector<512x16xf32>
    %4 = tpu.matmul %2, %3, %cst {dimension_numbers = #tpu.dot_dimension_numbers<[1], [0], [0], [1], [0, 0, 1, 1], [], []>} : vector<512x27xbf16>, vector<27x16xbf16>, vector<512x16xf32> -> vector<512x16xf32>
    %c0_3 = arith.constant 0 : index
    %c0_4 = arith.constant 0 : index
    %5 = vector.load %arg3[%c0_3, %c0_4] : memref<1x16xf32, #tpu.memory_space<vmem>>, vector<1x16xf32>
    %6 = vector.broadcast %5 : vector<1x16xf32> to vector<512x16xf32>
    %7 = arith.addf %4, %6 : vector<512x16xf32>
    %cst_5 = arith.constant 3.000000e+00 : f32
    %8 = vector.broadcast %cst_5 : f32 to vector<512x16xf32>
    %9 = arith.addf %7, %8 : vector<512x16xf32>
    %cst_6 = arith.constant 0.000000e+00 : f32
    %cst_7 = arith.constant 6.000000e+00 : f32
    %10 = vector.broadcast %cst_6 : f32 to vector<512x16xf32>
    %11 = arith.maximumf %10, %9 : vector<512x16xf32>
    %12 = vector.broadcast %cst_7 : f32 to vector<512x16xf32>
    %13 = arith.minimumf %12, %11 : vector<512x16xf32>
    %14 = arith.mulf %7, %13 : vector<512x16xf32>
    %cst_8 = arith.constant 0.166666672 : f32
    %15 = vector.broadcast %cst_8 : f32 to vector<512x16xf32>
    %16 = arith.mulf %14, %15 : vector<512x16xf32>
    %c0_9 = arith.constant 0 : index
    %c0_10 = arith.constant 0 : index
    %17 = vector.load %arg4[%c0_9, %c0_10] : memref<512x16xf32, #tpu.memory_space<vmem>>, vector<512x16xf32>
    tpu.vector_store %arg4[%c0_9, %c0_10], %16 {strides = array<i32>} : memref<512x16xf32, #tpu.memory_space<vmem>>, vector<512x16xf32>,
    return
  }
  func.func @transform_0(%arg0: i32) -> (i32, i32) {
    %c0_i32 = arith.constant 0 : i32
    %c0_i32_0 = arith.constant 0 : i32
    return %arg0, %c0_i32 : i32, i32
  }
  func.func @transform_1(%arg0: i32) -> (i32, i32) {
    %c0_i32 = arith.constant 0 : i32
    %c0_i32_0 = arith.constant 0 : i32
    %c0_i32_1 = arith.constant 0 : i32
    return %c0_i32, %c0_i32_0 : i32, i32
  }
  func.func @transform_2(%arg0: i32) -> (i32, i32) {
    %c0_i32 = arith.constant 0 : i32
    %c0_i32_0 = arith.constant 0 : i32
    %c0_i32_1 = arith.constant 0 : i32
    return %c0_i32, %c0_i32_0 : i32, i32
  }
  func.func @transform_3(%arg0: i32) -> (i32, i32) {
    %c0_i32 = arith.constant 0 : i32
    %c0_i32_0 = arith.constant 0 : i32
    return %arg0, %c0_i32 : i32, i32
  }
}

</mosaic_0001>

<bundles_post_ra>
// kernel: tpu_custom_call.1
= control target key start
LH: loop header
LB: loop body
LE: loop exit
PB: predicated region body
PF: predicated region fallthrough
CT: control target
= control target key end

     0   :  { %s1306_s12 = smov 0   ;;  %s1759_s0 = inlined_call_operand.vmem [shape: f32[2048,27], index: 0, kind: input, shape index: {}]   ;;  %s1760_s1 = inlined_call_operand.vmem [shape: f32[27,16], index: 1, kind: input, shape index: {}]   ;;  %s1761_s2 = inlined_call_operand.vmem [shape: f32[1,16], index: 2, kind: input, shape index: {}]   ;;  %s1762_s3 = inlined_call_operand.vmem [shape: f32[2048,16], index: 3, kind: output, shape index: {}]  }
   0x1 LB: > { %s1118_s13 = sadd.s32 4294967295, %s1283_s12   ;;  %p1122_p0 = scmp.ge.s32.totalorder %s1283_s12, 1  ;;  %s1283_s12 = sphi %s1306_s12, %s13_s12  }
   0x2   : > { %p138_p1 = scmp.lt.s32.totalorder %s1283_s12, 5 }
   0x4   : > { %p139_p2 = pnand %p1122_p0, %p138_p1 }
   0x5   : > { %v239_v0 = vld [vmem:[%s1760_s1] sm:$0xff] (!%p139_p2)  ;;  %v240_v1 = vld [vmem:[%s1760_s1 + $0x8] sm:$0xff] (!%p139_p2)  ;;  %v241_v2 = vld [vmem:[%s1760_s1 + $0x10] sm:$0xff] (!%p139_p2)  ;;  %vm381_vm0 = vcmask (!%p139_p2), 1044480   ;;  %vm382_vm1 = vcmask (!%p139_p2), 1045504   ;;  %v1285_v5 = vmov (!%p139_p2), 65535  }
   0x6   : > { %142 = sbr.rel (%p139_p2) target bundleno = 333 (0x14d), region = 32  ;;  %v275_v3 = vpack.c.bf16 (!%p139_p2), %v240_v1, %v239_v0  ;;  %v242_v4 = vld [vmem:[%s1760_s1 + $0x18] sm:$0x7] (!%p139_p2)  ;;  %v383_v6 = vsel (!%p139_p2), %vm381_vm0, 4294967295, %v1285_v5  ;;  %s1123_s22 = sshll.u32 (!%p139_p2), %s1118_s13, 6  ;;  %vm284_vm2 = vcmask (!%p139_p2), 220160  }
   0x7   : > { %v276_v7 = vpack.c.bf16 (!%p139_p2), %v242_v4, %v241_v2  ;;  %v384_v8 = vsel (!%p139_p2), %vm382_vm1, %v383_v6, 0  ;;  %p163_p3 = scmp.lt.s32.totalorder (!%p139_p2), %s1123_s22, 255  ;;  %vm997_vm3 = vcmask (!%p139_p2), 130048  }
   0x8   : > { %1196 = vmatprep.subr.bf16.mxu0 (!%p139_p2), %v275_v3  ;;  %1264 = vmatprep.subr.bf16.mxu1 (!%p139_p2), %v275_v3 }
   0x9   : > { %1197 = vmatpush3.bf16.msra.mxu0 (!%p139_p2), %v275_v3  ;;  %1266 = vmatpush3.bf16.msra.mxu1 (!%p139_p2), %v275_v3  ;;  %v386_v9 = vand.u32 (!%p139_p2), %v384_v8, %v276_v7 }
   0xb   : > { %1198 = vmatprep.subr.bf16.mxu0 (!%p139_p2), %v386_v9  ;;  %1265 = vmatprep.subr.bf16.mxu1 (!%p139_p2), %v386_v9 }
   0xd   : > { %s1764_s22 = smov (!%p163_p3, %s1123_s22), 255  ;;  %1199 = vmatpush3.bf16.msra.mxu0 %v386_v9  ;;  %1267 = vmatpush3.bf16.msra.mxu1 %v386_v9 }
   0xe   : > { %s1124_s23 = sshll.u32 %s1764_s22, 3 }
   0xf   : > { %s1334_s26 = scalar_lea.vmem %s1759_s0, %s1124_s23  ;;  %s1450_s4 = scalar_lea.vmem %s1762_s3, %s1124_s23 }
  0x10   : > { %v175_v10 = vld [vmem:[%s1334_s26] sm:$0xff]  ;;  %v176_v11 = vld [vmem:[%s1334_s26 + $0x8] sm:$0xff]  ;;  %v177_v15 = vld [vmem:[%s1334_s26 + $0x10] sm:$0xff] }
  0x11   : > { %v207_v12 = vld [vmem:[%s1334_s26 + $0x100] sm:$0xff]  ;;  %v243_v13 = vpack.c.bf16 %v176_v11, %v175_v10  ;;  %v208_v14 = vld [vmem:[%s1334_s26 + $0x108] sm:$0xff]  ;;  %v178_v16 = vld [vmem:[%s1334_s26 + $0x18] sm:$0xff] }
  0x12   : > { %v259_v17 = vpack.c.bf16 %v208_v14, %v207_v12  ;;  %v244_v18 = vpack.c.bf16 %v178_v16, %v177_v15  ;;  %v209_v19 = vld [vmem:[%s1334_s26 + $0x110] sm:$0xff]  ;;  %v210_v20 = vld [vmem:[%s1334_s26 + $0x118] sm:$0xff]  ;;  %v179_v21 = vld [vmem:[%s1334_s26 + $0x20] sm:$0xff] }
  0x13   : > { %1200 = vmatprep.mubr.msk.bf16.mxu0 %vm284_vm2, %v243_v13  ;;  %v260_v22 = vpack.c.bf16 %v210_v20, %v209_v19  ;;  %v180_v23 = vld [vmem:[%s1334_s26 + $0x28] sm:$0xff]  ;;  %v211_v24 = vld [vmem:[%s1334_s26 + $0x120] sm:$0xff]  ;;  %v181_v28 = vld [vmem:[%s1334_s26 + $0x30] sm:$0xff] }
  0x14   : > { %v212_v25 = vld [vmem:[%s1334_s26 + $0x128] sm:$0xff]  ;;  %1232 = vmatprep.mubr.msk.bf16.mxu1 %vm284_vm2, %v259_v17  ;;  %1201 = vmatmul.mubr.msk.bf16.vlgmr.msra.gmra.mrb[0].mxu0 %vm284_vm2, %v244_v18  ;;  %v245_v26 = vpack.c.bf16 %v180_v23, %v179_v21  ;;  %v182_v29 = vld [vmem:[%s1334_s26 + $0x38] sm:$0xff]  ;;  %v213_v30 = vld [vmem:[%s1334_s26 + $0x130] sm:$0xff] }
  0x15   : > { %v261_v27 = vpack.c.bf16 %v212_v25, %v211_v24  ;;  %1233 = vmatmul.mubr.msk.bf16.vlgmr.msra.gmra.mrb[0].mxu1 %vm284_vm2, %v260_v22  ;;  %v214_v31 = vld [vmem:[%s1334_s26 + $0x138] sm:$0xff]  ;;  %v183_v32 = vld [vmem:[%s1334_s26 + $0x40] sm:$0xff]  ;;  %v184_v33 = vld [vmem:[%s1334_s26 + $0x48] sm:$0xff]  ;;  %v246_v36 = vpack.c.bf16 %v182_v29, %v181_v28 }
  0x16   : > { %1204 = vmatprep.mubr.msk.bf16.mxu0 %vm284_vm2, %v245_v26  ;;  %v215_v34 = vld [vmem:[%s1334_s26 + $0x140] sm:$0xff]  ;;  %v216_v35 = vld [vmem:[%s1334_s26 + $0x148] sm:$0xff]  ;;  %v262_v37 = vpack.c.bf16 %v214_v31, %v213_v30  ;;  %v247_v38 = vpack.c.bf16 %v184_v33, %v183_v32  ;;  %v185_v40 = vld [vmem:[%s1334_s26 + $0x50] sm:$0xff] }
  0x17   : > { %1236 = vmatprep.mubr.msk.bf16.mxu1 %vm284_vm2, %v261_v27  ;;  %v263_v39 = vpack.c.bf16 %v216_v35, %v215_v34  ;;  %v186_v41 = vld [vmem:[%s1334_s26 + $0x58] sm:$0xff]  ;;  %v217_v42 = vld [vmem:[%s1334_s26 + $0x150] sm:$0xff]  ;;  %v187_v44 = vld [vmem:[%s1334_s26 + $0x60] sm:$0xff] }
  0x18   : > { %v218_v43 = vld [vmem:[%s1334_s26 + $0x158] sm:$0xff]  ;;  %v188_v45 = vld [vmem:[%s1334_s26 + $0x68] sm:$0xff]  ;;  %v219_v46 = vld [vmem:[%s1334_s26 + $0x160] sm:$0xff]  ;;  %v248_v48 = vpack.c.bf16 %v186_v41, %v185_v40 }
  0x19   : > { %v220_v47 = vld [vmem:[%s1334_s26 + $0x168] sm:$0xff]  ;;  %v264_v49 = vpack.c.bf16 %v218_v43, %v217_v42  ;;  %v249_v50 = vpack.c.bf16 %v188_v45, %v187_v44  ;;  %v189_v52 = vld [vmem:[%s1334_s26 + $0x70] sm:$0xff]  ;;  %v190_v53 = vld [vmem:[%s1334_s26 + $0x78] sm:$0xff] }
  0x1a   : > { %v265_v51 = vpack.c.bf16 %v220_v47, %v219_v46  ;;  %v221_v54 = vld [vmem:[%s1334_s26 + $0x170] sm:$0xff]  ;;  %v222_v55 = vld [vmem:[%s1334_s26 + $0x178] sm:$0xff]  ;;  %v191_v56 = vld [vmem:[%s1334_s26 + $0x80] sm:$0xff]  ;;  %v250_v60 = vpack.c.bf16 %v190_v53, %v189_v52 }
  0x1b   : > { %v192_v57 = vld [vmem:[%s1334_s26 + $0x88] sm:$0xff]  ;;  %v223_v58 = vld [vmem:[%s1334_s26 + $0x180] sm:$0xff]  ;;  %v266_v61 = vpack.c.bf16 %v222_v55, %v221_v54  ;;  %v193_v0 = vld [vmem:[%s1334_s26 + $0x90] sm:$0xff] }
  0x1c   : > { %1205 = vmatmul.mubr.msk.bf16.gmra.mrb[4].mxu0 %vm284_vm2, %v246_v36  ;;  %v224_v59 = vld [vmem:[%s1334_s26 + $0x188] sm:$0xff]  ;;  %v251_v62 = vpack.c.bf16 %v192_v57, %v191_v56  ;;  %v194_v1 = vld [vmem:[%s1334_s26 + $0x98] sm:$0xff]  ;;  %v225_v2 = vld [vmem:[%s1334_s26 + $0x190] sm:$0xff] }
  0x1d   : > { %1237 = vmatmul.mubr.msk.bf16.gmra.mrb[4].mxu1 %vm284_vm2, %v262_v37  ;;  %1208 = vmatprep.mubr.msk.bf16.mxu0 %vm284_vm2, %v247_v38  ;;  %v267_v63 = vpack.c.bf16 %v224_v59, %v223_v58  ;;  %v226_v3 = vld [vmem:[%s1334_s26 + $0x198] sm:$0xff]  ;;  %v195_v4 = vld [vmem:[%s1334_s26 + $0xa0] sm:$0xff]  ;;  %v196_v5 = vld [vmem:[%s1334_s26 + $0xa8] sm:$0xff]  ;;  %v252_v8 = vpack.c.bf16 %v194_v1, %v193_v0 }
  0x1e   : > { %1240 = vmatprep.mubr.msk.bf16.mxu1 %vm284_vm2, %v263_v39  ;;  %v227_v6 = vld [vmem:[%s1334_s26 + $0x1a0] sm:$0xff]  ;;  %v228_v7 = vld [vmem:[%s1334_s26 + $0x1a8] sm:$0xff]  ;;  %v268_v9 = vpack.c.bf16 %v226_v3, %v225_v2  ;;  %v253_v10 = vpack.c.bf16 %v196_v5, %v195_v4  ;;  %v197_v12 = vld [vmem:[%s1334_s26 + $0xb0] sm:$0xff] }
  0x1f   : > { %v269_v11 = vpack.c.bf16 %v228_v7, %v227_v6  ;;  %v198_v13 = vld [vmem:[%s1334_s26 + $0xb8] sm:$0xff]  ;;  %v229_v14 = vld [vmem:[%s1334_s26 + $0x1b0] sm:$0xff]  ;;  %v199_v16 = vld [vmem:[%s1334_s26 + $0xc0] sm:$0xff] }
  0x20   : > { %v230_v15 = vld [vmem:[%s1334_s26 + $0x1b8] sm:$0xff]  ;;  %v200_v17 = vld [vmem:[%s1334_s26 + $0xc8] sm:$0xff]  ;;  %v231_v18 = vld [vmem:[%s1334_s26 + $0x1c0] sm:$0xff]  ;;  %v254_v20 = vpack.c.bf16 %v198_v13, %v197_v12 }
  0x21   : > { %v232_v19 = vld [vmem:[%s1334_s26 + $0x1c8] sm:$0xff]  ;;  %v270_v21 = vpack.c.bf16 %v230_v15, %v229_v14  ;;  %v255_v22 = vpack.c.bf16 %v200_v17, %v199_v16  ;;  %v201_v24 = vld [vmem:[%s1334_s26 + $0xd0] sm:$0xff]  ;;  %v202_v25 = vld [vmem:[%s1334_s26 + $0xd8] sm:$0xff] }
  0x22   : > { %v271_v23 = vpack.c.bf16 %v232_v19, %v231_v18  ;;  %v233_v26 = vld [vmem:[%s1334_s26 + $0x1d0] sm:$0xff]  ;;  %v234_v27 = vld [vmem:[%s1334_s26 + $0x1d8] sm:$0xff]  ;;  %v203_v28 = vld [vmem:[%s1334_s26 + $0xe0] sm:$0xff]  ;;  %v256_v32 = vpack.c.bf16 %v202_v25, %v201_v24 }
  0x23   : > { %v204_v29 = vld [vmem:[%s1334_s26 + $0xe8] sm:$0xff]  ;;  %v235_v30 = vld [vmem:[%s1334_s26 + $0x1e0] sm:$0xff]  ;;  %v272_v33 = vpack.c.bf16 %v234_v27, %v233_v26  ;;  %v205_v36 = vld [vmem:[%s1334_s26 + $0xf0] sm:$0xff] }
  0x24   : > { %1209 = vmatmul.mubr.msk.bf16.gmra.mrb[8].mxu0 %vm284_vm2, %v248_v48  ;;  %v236_v31 = vld [vmem:[%s1334_s26 + $0x1e8] sm:$0xff]  ;;  %v257_v34 = vpack.c.bf16 %v204_v29, %v203_v28  ;;  %v206_v37 = vld [vmem:[%s1334_s26 + $0xf8] sm:$0xff]  ;;  %v237_v38 = vld [vmem:[%s1334_s26 + $0x1f0] sm:$0xff] }
  0x25   : > { %1241 = vmatmul.mubr.msk.bf16.gmra.mrb[8].mxu1 %vm284_vm2, %v264_v49  ;;  %1212 = vmatprep.mubr.msk.bf16.mxu0 %vm284_vm2, %v249_v50  ;;  %v273_v35 = vpack.c.bf16 %v236_v31, %v235_v30  ;;  %v238_v39 = vld [vmem:[%s1334_s26 + $0x1f8] sm:$0xff]  ;;  %v258_v40 = vpack.c.bf16 %v206_v37, %v205_v36  ;;  %v1435_v42 = vld [vmem:[%s1761_s2] ss:$0 sm:$0xff] }
  0x26   : > { %1244 = vmatprep.mubr.msk.bf16.mxu1 %vm284_vm2, %v265_v51  ;;  %v274_v41 = vpack.c.bf16 %v238_v39, %v237_v38 }
  0x2c   : > { %1213 = vmatmul.mubr.msk.bf16.gmra.mrb[12].mxu0 %vm284_vm2, %v250_v60 }
  0x2d   : > { %1245 = vmatmul.mubr.msk.bf16.gmra.mrb[12].mxu1 %vm284_vm2, %v266_v61  ;;  %1216 = vmatprep.mubr.msk.bf16.mxu0 %vm284_vm2, %v251_v62 }
  0x2e   : > { %1248 = vmatprep.mubr.msk.bf16.mxu1 %vm284_vm2, %v267_v63 }
  0x34   : > { %1217 = vmatmul.mubr.msk.bf16.gmra.mrb[16].mxu0 %vm284_vm2, %v252_v8 }
  0x35   : > { %1249 = vmatmul.mubr.msk.bf16.gmra.mrb[16].mxu1 %vm284_vm2, %v268_v9  ;;  %1220 = vmatprep.mubr.msk.bf16.mxu0 %vm284_vm2, %v253_v10 }
  0x36   : > { %1252 = vmatprep.mubr.msk.bf16.mxu1 %vm284_vm2, %v269_v11 }
  0x3c   : > { %1221 = vmatmul.mubr.msk.bf16.gmra.mrb[20].mxu0 %vm284_vm2, %v254_v20 }
  0x3d   : > { %1253 = vmatmul.mubr.msk.bf16.gmra.mrb[20].mxu1 %vm284_vm2, %v270_v21  ;;  %1224 = vmatprep.mubr.msk.bf16.mxu0 %vm284_vm2, %v255_v22 }
  0x3e   : > { %1256 = vmatprep.mubr.msk.bf16.mxu1 %vm284_vm2, %v271_v23 }
  0x44   : > { %1225 = vmatmul.mubr.msk.bf16.gmra.mrb[24].mxu0 %vm284_vm2, %v256_v32 }
  0x45   : > { %1257 = vmatmul.mubr.msk.bf16.gmra.mrb[24].mxu1 %vm284_vm2, %v272_v33  ;;  %1228 = vmatprep.mubr.msk.bf16.mxu0 %vm284_vm2, %v257_v34 }
  0x46   : > { %1260 = vmatprep.mubr.msk.bf16.mxu1 %vm284_vm2, %v273_v35 }
  0x4c   : > { %1229 = vmatmul.mubr.msk.bf16.gmra.mrb[28].mxu0 %vm284_vm2, %v258_v40 }
  0x4d   : > { %1261 = vmatmul.mubr.msk.bf16.gmra.mrb[28].mxu1 %vm284_vm2, %v274_v41 }
  0xe7   : > { %v1202_v43 = vpop.f32.mrb[0].mxu0 }
  0xe8   : > { %v431_v44 = vadd.f32 %v1202_v43, %v1435_v42  ;;  %v1234_v45 = vpop.f32.mrb[0].mxu1  ;;  %v422_v46 = vpop.f32.mrb[1].mxu0 }
  0xe9   : > { %v559_v47 = vadd.f32 %v1234_v45, %v1435_v42  ;;  %v423_v48 = vadd.f32 %v1435_v42, %v422_v46  ;;  %v550_v49 = vpop.f32.mrb[1].mxu1  ;;  %v1203_v50 = vpop.f32.mrb[2].mxu0 }
  0xea   : > { %v679_v51 = vadd.f32 3.0, %v431_v44  ;;  %v551_v52 = vadd.f32 %v1435_v42, %v550_v49  ;;  %v434_v53 = vadd.f32 %v1203_v50, %v1435_v42  ;;  %v1235_v54 = vpop.f32.mrb[2].mxu1  ;;  %v425_v55 = vpop.f32.mrb[3].mxu0 }
  0xeb   : > { %v711_v56 = vadd.f32 3.0, %v559_v47  ;;  %v677_v57 = vadd.f32 3.0, %v423_v48  ;;  %v562_v58 = vadd.f32 %v1235_v54, %v1435_v42  ;;  %v426_v59 = vadd.f32 %v1435_v42, %v425_v55  ;;  %v553_v60 = vpop.f32.mrb[3].mxu1 }
  0xec   : > { %v743_v61 = vmax.f32 %v679_v51, 0.0  ;;  %v709_v62 = vadd.f32 3.0, %v551_v52  ;;  %v680_v63 = vadd.f32 3.0, %v434_v53  ;;  %v554_v0 = vadd.f32 %v1435_v42, %v553_v60 }
  0xed   : > { %v775_v1 = vmax.f32 %v711_v56, 0.0  ;;  %v741_v2 = vmax.f32 %v677_v57, 0.0  ;;  %v712_v3 = vadd.f32 3.0, %v562_v58  ;;  %v678_v4 = vadd.f32 3.0, %v426_v59 }
  0xee   : > { %v807_v5 = vmin.f32 %v743_v61, 6.0  ;;  %v773_v6 = vmax.f32 %v709_v62, 0.0  ;;  %v744_v7 = vmax.f32 %v680_v63, 0.0  ;;  %v710_v8 = vadd.f32 3.0, %v554_v0 }
  0xef   : > { %v839_v9 = vmin.f32 %v775_v1, 6.0  ;;  %v805_v10 = vmin.f32 %v741_v2, 6.0  ;;  %v776_v11 = vmax.f32 %v712_v3, 0.0  ;;  %v742_v12 = vmax.f32 %v678_v4, 0.0  ;;  %v1206_v13 = vpop.f32.mrb[4].mxu0 }
  0xf0   : > { %v871_v14 = vmul.f32 %v807_v5, %v431_v44  ;;  %v837_v15 = vmin.f32 %v773_v6, 6.0  ;;  %v808_v16 = vmin.f32 %v744_v7, 6.0  ;;  %v774_v17 = vmax.f32 %v710_v8, 0.0  ;;  %v1238_v18 = vpop.f32.mrb[4].mxu1  ;;  %v438_v19 = vpop.f32.mrb[5].mxu0 }
  0xf1   : > { %v903_v20 = vmul.f32 %v839_v9, %v559_v47  ;;  %v869_v21 = vmul.f32 %v805_v10, %v423_v48  ;;  %v840_v22 = vmin.f32 %v776_v11, 6.0  ;;  %v806_v23 = vmin.f32 %v742_v12, 6.0  ;;  %v566_v24 = vpop.f32.mrb[5].mxu1  ;;  %v1207_v25 = vpop.f32.mrb[6].mxu0 }
  0xf2   : > { %v935_v26 = vmul.f32 0.16666667, %v871_v14  ;;  %v901_v27 = vmul.f32 %v837_v15, %v551_v52  ;;  %v872_v28 = vmul.f32 %v808_v16, %v434_v53  ;;  %v838_v29 = vmin.f32 %v774_v17, 6.0  ;;  %v1239_v30 = vpop.f32.mrb[6].mxu1  ;;  %v441_v31 = vpop.f32.mrb[7].mxu0 }
  0xf3   : > { %v967_v32 = vmul.f32 0.16666667, %v903_v20  ;;  %v933_v33 = vmul.f32 0.16666667, %v869_v21  ;;  %v904_v34 = vmul.f32 %v840_v22, %v562_v58  ;;  %v870_v35 = vmul.f32 %v806_v23, %v426_v59  ;;  %v569_v36 = vpop.f32.mrb[7].mxu1 }
  0xf4   : > { %1000 = vst.msk [vmem:[%s1450_s4 + $0x10] sm:$0xff] %vm997_vm3, %v935_v26  ;;  %v965_v37 = vmul.f32 0.16666667, %v901_v27  ;;  %v936_v38 = vmul.f32 0.16666667, %v872_v28  ;;  %v902_v39 = vmul.f32 %v838_v29, %v554_v0  ;;  %v447_v40 = vadd.f32 %v1206_v13, %v1435_v42 }
  0xf5   : > { %1032 = vst.msk [vmem:[%s1450_s4 + $0x110] sm:$0xff] %vm997_vm3, %v967_v32  ;;  %998 = vst.msk [vmem:[%s1450_s4] sm:$0xff] %vm997_vm3, %v933_v33  ;;  %v968_v41 = vmul.f32 0.16666667, %v904_v34  ;;  %v934_v43 = vmul.f32 0.16666667, %v870_v35  ;;  %v575_v44 = vadd.f32 %v1238_v18, %v1435_v42  ;;  %v439_v45 = vadd.f32 %v1435_v42, %v438_v19 }
  0xf6   : > { %1030 = vst.msk [vmem:[%s1450_s4 + $0x100] sm:$0xff] %vm997_vm3, %v965_v37  ;;  %1001 = vst.msk [vmem:[%s1450_s4 + $0x18] sm:$0xff] %vm997_vm3, %v936_v38  ;;  %v966_v46 = vmul.f32 0.16666667, %v902_v39  ;;  %v683_v47 = vadd.f32 3.0, %v447_v40  ;;  %v567_v48 = vadd.f32 %v1435_v42, %v566_v24  ;;  %v450_v49 = vadd.f32 %v1207_v25, %v1435_v42 }
  0xf7   : > { %1033 = vst.msk [vmem:[%s1450_s4 + $0x118] sm:$0xff] %vm997_vm3, %v968_v41  ;;  %999 = vst.msk [vmem:[%s1450_s4 + $0x8] sm:$0xff] %vm997_vm3, %v934_v43  ;;  %v715_v50 = vadd.f32 3.0, %v575_v44  ;;  %v681_v51 = vadd.f32 3.0, %v439_v45  ;;  %v578_v52 = vadd.f32 %v1239_v30, %v1435_v42  ;;  %v442_v53 = vadd.f32 %v1435_v42, %v441_v31  ;;  %v1210_v54 = vpop.f32.mrb[8].mxu0 }
  0xf8   : > { %1031 = vst.msk [vmem:[%s1450_s4 + $0x108] sm:$0xff] %vm997_vm3, %v966_v46  ;;  %v747_v55 = vmax.f32 %v683_v47, 0.0  ;;  %v713_v56 = vadd.f32 3.0, %v567_v48  ;;  %v684_v57 = vadd.f32 3.0, %v450_v49  ;;  %v570_v58 = vadd.f32 %v1435_v42, %v569_v36  ;;  %v1242_v59 = vpop.f32.mrb[8].mxu1  ;;  %v454_v60 = vpop.f32.mrb[9].mxu0 }
  0xf9   : > { %v779_v61 = vmax.f32 %v715_v50, 0.0  ;;  %v745_v62 = vmax.f32 %v681_v51, 0.0  ;;  %v716_v63 = vadd.f32 3.0, %v578_v52  ;;  %v682_v0 = vadd.f32 3.0, %v442_v53  ;;  %v582_v1 = vpop.f32.mrb[9].mxu1  ;;  %v1211_v2 = vpop.f32.mrb[10].mxu0 }
  0xfa   : > { %v811_v3 = vmin.f32 %v747_v55, 6.0  ;;  %v777_v4 = vmax.f32 %v713_v56, 0.0  ;;  %v748_v5 = vmax.f32 %v684_v57, 0.0  ;;  %v714_v6 = vadd.f32 3.0, %v570_v58  ;;  %v1243_v7 = vpop.f32.mrb[10].mxu1  ;;  %v457_v8 = vpop.f32.mrb[11].mxu0 }
  0xfb   : > { %v843_v9 = vmin.f32 %v779_v61, 6.0  ;;  %v809_v10 = vmin.f32 %v745_v62, 6.0  ;;  %v780_v11 = vmax.f32 %v716_v63, 0.0  ;;  %v746_v12 = vmax.f32 %v682_v0, 0.0  ;;  %v585_v13 = vpop.f32.mrb[11].mxu1 }
  0xfc   : > { %v875_v14 = vmul.f32 %v811_v3, %v447_v40  ;;  %v841_v15 = vmin.f32 %v777_v4, 6.0  ;;  %v812_v16 = vmin.f32 %v748_v5, 6.0  ;;  %v778_v17 = vmax.f32 %v714_v6, 0.0 }
  0xfd   : > { %v907_v18 = vmul.f32 %v843_v9, %v575_v44  ;;  %v873_v19 = vmul.f32 %v809_v10, %v439_v45  ;;  %v844_v20 = vmin.f32 %v780_v11, 6.0  ;;  %v810_v21 = vmin.f32 %v746_v12, 6.0 }
  0xfe   : > { %v939_v22 = vmul.f32 0.16666667, %v875_v14  ;;  %v905_v23 = vmul.f32 %v841_v15, %v567_v48  ;;  %v876_v24 = vmul.f32 %v812_v16, %v450_v49  ;;  %v842_v25 = vmin.f32 %v778_v17, 6.0 }
  0xff   : > { %v971_v26 = vmul.f32 0.16666667, %v907_v18  ;;  %v937_v27 = vmul.f32 0.16666667, %v873_v19  ;;  %v908_v28 = vmul.f32 %v844_v20, %v578_v52  ;;  %v874_v29 = vmul.f32 %v810_v21, %v442_v53  ;;  %v1476_v30 = vpop.f32.mrb[12].mxu0 }
 0x100   : > { %1004 = vst.msk [vmem:[%s1450_s4 + $0x30] sm:$0xff] %vm997_vm3, %v939_v22  ;;  %v969_v31 = vmul.f32 0.16666667, %v905_v23  ;;  %v940_v32 = vmul.f32 0.16666667, %v876_v24  ;;  %v906_v33 = vmul.f32 %v842_v25, %v570_v58  ;;  %v463_v34 = vadd.f32 %v1210_v54, %v1435_v42  ;;  %v1481_v35 = vpop.f32.mrb[12].mxu1 }
 0x101   : > { %v1483_v36 = vpop.f32.mrb[13].mxu0  ;;  %1036 = vst.msk [vmem:[%s1450_s4 + $0x130] sm:$0xff] %vm997_vm3, %v971_v26  ;;  %1002 = vst.msk [vmem:[%s1450_s4 + $0x20] sm:$0xff] %vm997_vm3, %v937_v27  ;;  %v972_v37 = vmul.f32 0.16666667, %v908_v28  ;;  %v591_v39 = vadd.f32 %v1242_v59, %v1435_v42  ;;  %v455_v40 = vadd.f32 %v1435_v42, %v454_v60  ;;  %v1491_v41 = vpop.f32.mrb[13].mxu1  ;;  %v583_v46 = vadd.f32 %v1435_v42, %v582_v1 }
 0x102   : > { %v938_v38 = vmul.f32 0.16666667, %v874_v29  ;;  %v1493_v43 = vpop.f32.mrb[14].mxu0  ;;  %1034 = vst.msk [vmem:[%s1450_s4 + $0x120] sm:$0xff] %vm997_vm3, %v969_v31  ;;  %1005 = vst.msk [vmem:[%s1450_s4 + $0x38] sm:$0xff] %vm997_vm3, %v940_v32  ;;  %v687_v45 = vadd.f32 3.0, %v463_v34  ;;  %v466_v47 = vadd.f32 %v1211_v2, %v1435_v42  ;;  %v594_v52 = vadd.f32 %v1243_v7, %v1435_v42 }
 0x103   : > { %v970_v44 = vmul.f32 0.16666667, %v906_v33  ;;  %v1501_v48 = vpop.f32.mrb[14].mxu1  ;;  %v1503_v49 = vpop.f32.mrb[15].mxu0  ;;  %1037 = vst.msk [vmem:[%s1450_s4 + $0x138] sm:$0xff] %vm997_vm3, %v972_v37  ;;  %v719_v50 = vadd.f32 3.0, %v591_v39  ;;  %v458_v53 = vadd.f32 %v1435_v42, %v457_v8  ;;  %v586_v58 = vadd.f32 %v1435_v42, %v585_v13 }
 0x104   : > { %1003 = vst.msk [vmem:[%s1450_s4 + $0x28] sm:$0xff] %vm997_vm3, %v938_v38  ;;  %v685_v51 = vadd.f32 3.0, %v455_v40  ;;  %v1511_v54 = vpop.f32.mrb[15].mxu1  ;;  %v751_v55 = vmax.f32 %v687_v45, 0.0  ;;  %v717_v56 = vadd.f32 3.0, %v583_v46  ;;  %v688_v57 = vadd.f32 3.0, %v466_v47 }
 0x105   : > { %1035 = vst.msk [vmem:[%s1450_s4 + $0x128] sm:$0xff] %vm997_vm3, %v970_v44  ;;  %v783_v59 = vmax.f32 %v719_v50, 0.0  ;;  %v720_v61 = vadd.f32 3.0, %v594_v52  ;;  %v686_v62 = vadd.f32 3.0, %v458_v53  ;;  %v718_v2 = vadd.f32 3.0, %v586_v58 }
 0x106   : > { %v749_v60 = vmax.f32 %v685_v51, 0.0  ;;  %v815_v63 = vmin.f32 %v751_v55, 6.0  ;;  %v781_v0 = vmax.f32 %v717_v56, 0.0  ;;  %v752_v1 = vmax.f32 %v688_v57, 0.0 }
 0x107   : > { %v847_v3 = vmin.f32 %v783_v59, 6.0  ;;  %v784_v5 = vmax.f32 %v720_v61, 0.0  ;;  %v750_v6 = vmax.f32 %v686_v62, 0.0  ;;  %v1516_v7 = vpop.f32.mrb[16].mxu0  ;;  %v782_v11 = vmax.f32 %v718_v2, 0.0 }
 0x108   : > { %v813_v4 = vmin.f32 %v749_v60, 6.0  ;;  %v879_v8 = vmul.f32 %v815_v63, %v463_v34  ;;  %v845_v9 = vmin.f32 %v781_v0, 6.0  ;;  %v816_v10 = vmin.f32 %v752_v1, 6.0  ;;  %v1518_v12 = vpop.f32.mrb[16].mxu1  ;;  %v1520_v13 = vpop.f32.mrb[17].mxu0 }
 0x109   : > { %v911_v14 = vmul.f32 %v847_v3, %v591_v39  ;;  %v848_v16 = vmin.f32 %v784_v5, 6.0  ;;  %v814_v17 = vmin.f32 %v750_v6, 6.0  ;;  %v1522_v18 = vpop.f32.mrb[17].mxu1  ;;  %v1524_v19 = vpop.f32.mrb[18].mxu0  ;;  %v846_v23 = vmin.f32 %v782_v11, 6.0 }
 0x10a   : > { %v877_v15 = vmul.f32 %v813_v4, %v455_v40  ;;  %v943_v20 = vmul.f32 0.16666667, %v879_v8  ;;  %v909_v21 = vmul.f32 %v845_v9, %v583_v46  ;;  %v880_v22 = vmul.f32 %v816_v10, %v466_v47  ;;  %v1526_v24 = vpop.f32.mrb[18].mxu1  ;;  %v1528_v25 = vpop.f32.mrb[19].mxu0 }
 0x10b   : > { %v975_v26 = vmul.f32 0.16666667, %v911_v14  ;;  %v912_v28 = vmul.f32 %v848_v16, %v594_v52  ;;  %v878_v29 = vmul.f32 %v814_v17, %v458_v53  ;;  %v1530_v31 = vpop.f32.mrb[19].mxu1  ;;  %v910_v34 = vmul.f32 %v846_v23, %v586_v58 }
 0x10c   : > { %v941_v27 = vmul.f32 0.16666667, %v877_v15  ;;  %1008 = vst.msk [vmem:[%s1450_s4 + $0x50] sm:$0xff] %vm997_vm3, %v943_v20  ;;  %v973_v32 = vmul.f32 0.16666667, %v909_v21  ;;  %v479_v37 = vadd.f32 %v1476_v30, %v1435_v42  ;;  %v607_v40 = vadd.f32 %v1481_v35, %v1435_v42 }
 0x10d   : > { %v944_v33 = vmul.f32 0.16666667, %v880_v22  ;;  %1040 = vst.msk [vmem:[%s1450_s4 + $0x150] sm:$0xff] %vm997_vm3, %v975_v26  ;;  %v976_v38 = vmul.f32 0.16666667, %v912_v28  ;;  %v471_v44 = vadd.f32 %v1435_v42, %v1483_v36  ;;  %v599_v30 = vadd.f32 %v1435_v42, %v1491_v41 }
 0x10e   : > { %1006 = vst.msk [vmem:[%s1450_s4 + $0x40] sm:$0xff] %vm997_vm3, %v941_v27  ;;  %v942_v39 = vmul.f32 0.16666667, %v878_v29  ;;  %1038 = vst.msk [vmem:[%s1450_s4 + $0x140] sm:$0xff] %vm997_vm3, %v973_v32  ;;  %v974_v45 = vmul.f32 0.16666667, %v910_v34  ;;  %v482_v47 = vadd.f32 %v1493_v43, %v1435_v42  ;;  %v610_v36 = vadd.f32 %v1501_v48, %v1435_v42 }
 0x10f   : > { %1009 = vst.msk [vmem:[%s1450_s4 + $0x58] sm:$0xff] %vm997_vm3, %v944_v33  ;;  %v691_v46 = vadd.f32 3.0, %v479_v37  ;;  %1041 = vst.msk [vmem:[%s1450_s4 + $0x158] sm:$0xff] %vm997_vm3, %v976_v38  ;;  %v723_v35 = vadd.f32 3.0, %v607_v40  ;;  %v689_v50 = vadd.f32 3.0, %v471_v44  ;;  %v474_v51 = vadd.f32 %v1435_v42, %v1503_v49  ;;  %v1560_v52 = vpop.f32.mrb[20].mxu0 }
 0x110   : > { %1007 = vst.msk [vmem:[%s1450_s4 + $0x48] sm:$0xff] %vm997_vm3, %v942_v39  ;;  %1039 = vst.msk [vmem:[%s1450_s4 + $0x148] sm:$0xff] %vm997_vm3, %v974_v45  ;;  %v721_v53 = vadd.f32 3.0, %v599_v30  ;;  %v692_v55 = vadd.f32 3.0, %v482_v47  ;;  %v602_v43 = vadd.f32 %v1435_v42, %v1511_v54  ;;  %v1566_v56 = vpop.f32.mrb[20].mxu1  ;;  %v1568_v57 = vpop.f32.mrb[21].mxu0  ;;  %v495_v39 = vadd.f32 %v1516_v7, %v1435_v42 }
 0x111   : > { %v755_v41 = vmax.f32 %v691_v46, 0.0  ;;  %v787_v58 = vmax.f32 %v723_v35, 0.0  ;;  %v753_v59 = vmax.f32 %v689_v50, 0.0  ;;  %v724_v48 = vadd.f32 3.0, %v610_v36  ;;  %v1570_v61 = vpop.f32.mrb[21].mxu1  ;;  %v1572_v49 = vpop.f32.mrb[22].mxu0 }
 0x112   : > { %v690_v60 = vadd.f32 3.0, %v474_v51  ;;  %v785_v63 = vmax.f32 %v721_v53, 0.0  ;;  %v756_v0 = vmax.f32 %v692_v55, 0.0  ;;  %v722_v1 = vadd.f32 3.0, %v602_v43  ;;  %v1574_v2 = vpop.f32.mrb[22].mxu1  ;;  %v1576_v3 = vpop.f32.mrb[23].mxu0 }
 0x113   : > { %v819_v62 = vmin.f32 %v755_v41, 6.0  ;;  %v851_v54 = vmin.f32 %v787_v58, 6.0  ;;  %v817_v4 = vmin.f32 %v753_v59, 6.0  ;;  %v788_v5 = vmax.f32 %v724_v48, 0.0  ;;  %v1578_v8 = vpop.f32.mrb[23].mxu1 }
 0x114   : > { %v754_v6 = vmax.f32 %v690_v60, 0.0  ;;  %v849_v10 = vmin.f32 %v785_v63, 6.0  ;;  %v820_v11 = vmin.f32 %v756_v0, 6.0  ;;  %v786_v14 = vmax.f32 %v722_v1, 0.0 }
 0x115   : > { %v883_v9 = vmul.f32 %v819_v62, %v479_v37  ;;  %v915_v15 = vmul.f32 %v851_v54, %v607_v40  ;;  %v881_v16 = vmul.f32 %v817_v4, %v471_v44  ;;  %v852_v17 = vmin.f32 %v788_v5, 6.0 }
 0x116   : > { %v818_v20 = vmin.f32 %v754_v6, 6.0  ;;  %v913_v22 = vmul.f32 %v849_v10, %v599_v30  ;;  %v884_v23 = vmul.f32 %v820_v11, %v482_v47  ;;  %v850_v26 = vmin.f32 %v786_v14, 6.0 }
 0x117   : > { %v947_v21 = vmul.f32 0.16666667, %v883_v9  ;;  %v979_v27 = vmul.f32 0.16666667, %v915_v15  ;;  %v945_v28 = vmul.f32 0.16666667, %v881_v16  ;;  %v916_v29 = vmul.f32 %v852_v17, %v610_v36 }
 0x118   : > { %v882_v32 = vmul.f32 %v818_v20, %v474_v51  ;;  %v1580_v33 = vpop.f32.mrb[24].mxu0  ;;  %v977_v34 = vmul.f32 0.16666667, %v913_v22  ;;  %v948_v37 = vmul.f32 0.16666667, %v884_v23  ;;  %v914_v38 = vmul.f32 %v850_v26, %v602_v43  ;;  %v1586_v40 = vpop.f32.mrb[24].mxu1 }
 0x119   : > { %1012 = vst.msk [vmem:[%s1450_s4 + $0x70] sm:$0xff] %vm997_vm3, %v947_v21  ;;  %v1588_v44 = vpop.f32.mrb[25].mxu0  ;;  %1044 = vst.msk [vmem:[%s1450_s4 + $0x170] sm:$0xff] %vm997_vm3, %v979_v27  ;;  %v980_v45 = vmul.f32 0.16666667, %v916_v29  ;;  %v623_v30 = vadd.f32 %v1518_v12, %v1435_v42  ;;  %v487_v47 = vadd.f32 %v1435_v42, %v1520_v13  ;;  %v1598_v35 = vpop.f32.mrb[25].mxu1  ;;  %v615_v51 = vadd.f32 %v1435_v42, %v1522_v18 }
 0x11a   : > { %1010 = vst.msk [vmem:[%s1450_s4 + $0x60] sm:$0xff] %vm997_vm3, %v945_v28  ;;  %v946_v46 = vmul.f32 0.16666667, %v882_v32  ;;  %v1600_v7 = vpop.f32.mrb[26].mxu0  ;;  %1042 = vst.msk [vmem:[%s1450_s4 + $0x160] sm:$0xff] %vm997_vm3, %v977_v34  ;;  %v695_v36 = vadd.f32 3.0, %v495_v39  ;;  %v498_v12 = vadd.f32 %v1524_v19, %v1435_v42  ;;  %v626_v43 = vadd.f32 %v1526_v24, %v1435_v42 }
 0x11b   : > { %1013 = vst.msk [vmem:[%s1450_s4 + $0x78] sm:$0xff] %vm997_vm3, %v948_v37  ;;  %v978_v50 = vmul.f32 0.16666667, %v914_v38  ;;  %v1610_v41 = vpop.f32.mrb[26].mxu1  ;;  %v1612_v13 = vpop.f32.mrb[27].mxu0  ;;  %1045 = vst.msk [vmem:[%s1450_s4 + $0x178] sm:$0xff] %vm997_vm3, %v980_v45  ;;  %v490_v58 = vadd.f32 %v1435_v42, %v1528_v25  ;;  %v618_v60 = vadd.f32 %v1435_v42, %v1530_v31 }
 0x11c   : > { %1011 = vst.msk [vmem:[%s1450_s4 + $0x68] sm:$0xff] %vm997_vm3, %v946_v46  ;;  %v727_v53 = vadd.f32 3.0, %v623_v30  ;;  %v693_v55 = vadd.f32 3.0, %v487_v47  ;;  %v1622_v18 = vpop.f32.mrb[27].mxu1  ;;  %v759_v19 = vmax.f32 %v695_v36, 0.0  ;;  %v725_v59 = vadd.f32 3.0, %v615_v51 }
 0x11d   : > { %1043 = vst.msk [vmem:[%s1450_s4 + $0x168] sm:$0xff] %vm997_vm3, %v978_v50  ;;  %v696_v48 = vadd.f32 3.0, %v498_v12  ;;  %v728_v0 = vadd.f32 3.0, %v626_v43  ;;  %v694_v1 = vadd.f32 3.0, %v490_v58  ;;  %v726_v5 = vadd.f32 3.0, %v618_v60 }
 0x11e   : > { %v791_v62 = vmax.f32 %v727_v53, 0.0  ;;  %v757_v63 = vmax.f32 %v693_v55, 0.0  ;;  %v823_v54 = vmin.f32 %v759_v19, 6.0  ;;  %v789_v4 = vmax.f32 %v725_v59, 0.0 }
 0x11f   : > { %v760_v24 = vmax.f32 %v696_v48, 0.0  ;;  %v792_v9 = vmax.f32 %v728_v0, 0.0  ;;  %v758_v10 = vmax.f32 %v694_v1, 0.0  ;;  %v1628_v11 = vpop.f32.mrb[28].mxu0  ;;  %v790_v17 = vmax.f32 %v726_v5, 0.0 }
 0x120   : > { %v855_v6 = vmin.f32 %v791_v62, 6.0  ;;  %v821_v25 = vmin.f32 %v757_v63, 6.0  ;;  %v887_v14 = vmul.f32 %v823_v54, %v495_v39  ;;  %v853_v15 = vmin.f32 %v789_v4, 6.0  ;;  %v1630_v20 = vpop.f32.mrb[28].mxu1  ;;  %v1632_v31 = vpop.f32.mrb[29].mxu0 }
 0x121   : > { %v824_v16 = vmin.f32 %v760_v24, 6.0  ;;  %v856_v23 = vmin.f32 %v792_v9, 6.0  ;;  %v822_v26 = vmin.f32 %v758_v10, 6.0  ;;  %v1634_v27 = vpop.f32.mrb[29].mxu1  ;;  %v1636_v28 = vpop.f32.mrb[30].mxu0  ;;  %v854_v37 = vmin.f32 %v790_v17, 6.0 }
 0x122   : > { %v919_v21 = vmul.f32 %v855_v6, %v623_v30  ;;  %v885_v22 = vmul.f32 %v821_v25, %v487_v47  ;;  %v951_v29 = vmul.f32 0.16666667, %v887_v14  ;;  %v917_v32 = vmul.f32 %v853_v15, %v615_v51  ;;  %v1638_v38 = vpop.f32.mrb[30].mxu1  ;;  %v1640_v39 = vpop.f32.mrb[31].mxu0 }
 0x123   : > { %v888_v34 = vmul.f32 %v824_v16, %v498_v12  ;;  %v920_v30 = vmul.f32 %v856_v23, %v626_v43  ;;  %v886_v47 = vmul.f32 %v822_v26, %v490_v58  ;;  %v1642_v50 = vpop.f32.mrb[31].mxu1  ;;  %v918_v12 = vmul.f32 %v854_v37, %v618_v60 }
 0x124   : > { %v983_v45 = vmul.f32 0.16666667, %v919_v21  ;;  %v949_v46 = vmul.f32 0.16666667, %v885_v22  ;;  %1016 = vst.msk [vmem:[%s1450_s4 + $0x90] sm:$0xff] %vm997_vm3, %v951_v29  ;;  %v511_v53 = vadd.f32 %v1560_v52, %v1435_v42  ;;  %v639_v58 = vadd.f32 %v1566_v56, %v1435_v42 }
 0x125   : > { %v981_v36 = vmul.f32 0.16666667, %v917_v32  ;;  %v952_v51 = vmul.f32 0.16666667, %v888_v34  ;;  %v984_v55 = vmul.f32 0.16666667, %v920_v30  ;;  %v503_v19 = vadd.f32 %v1435_v42, %v1568_v57 }
 0x126   : > { %1048 = vst.msk [vmem:[%s1450_s4 + $0x190] sm:$0xff] %vm997_vm3, %v983_v45  ;;  %1014 = vst.msk [vmem:[%s1450_s4 + $0x80] sm:$0xff] %vm997_vm3, %v949_v46  ;;  %v950_v43 = vmul.f32 0.16666667, %v886_v47  ;;  %v982_v59 = vmul.f32 0.16666667, %v918_v12  ;;  %v631_v52 = vadd.f32 %v1435_v42, %v1570_v61  ;;  %v514_v60 = vadd.f32 %v1572_v49, %v1435_v42 }
 0x127   : > { %1046 = vst.msk [vmem:[%s1450_s4 + $0x180] sm:$0xff] %vm997_vm3, %v981_v36  ;;  %1017 = vst.msk [vmem:[%s1450_s4 + $0x98] sm:$0xff] %vm997_vm3, %v952_v51  ;;  %v699_v48 = vadd.f32 3.0, %v511_v53  ;;  %v731_v56 = vadd.f32 3.0, %v639_v58  ;;  %v697_v62 = vadd.f32 3.0, %v503_v19  ;;  %v642_v57 = vadd.f32 %v1574_v2, %v1435_v42 }
 0x128   : > { %1049 = vst.msk [vmem:[%s1450_s4 + $0x198] sm:$0xff] %vm997_vm3, %v984_v55  ;;  %1015 = vst.msk [vmem:[%s1450_s4 + $0x88] sm:$0xff] %vm997_vm3, %v950_v43  ;;  %v506_v63 = vadd.f32 %v1435_v42, %v1576_v3  ;;  %v729_v1 = vadd.f32 3.0, %v631_v52  ;;  %v700_v61 = vadd.f32 3.0, %v514_v60  ;;  %v634_v49 = vadd.f32 %v1435_v42, %v1578_v8 }
 0x129   : > { %1047 = vst.msk [vmem:[%s1450_s4 + $0x188] sm:$0xff] %vm997_vm3, %v982_v59  ;;  %v763_v0 = vmax.f32 %v699_v48, 0.0  ;;  %v795_v54 = vmax.f32 %v731_v56, 0.0  ;;  %v761_v4 = vmax.f32 %v697_v62, 0.0  ;;  %v732_v24 = vadd.f32 3.0, %v642_v57 }
 0x12a   : > { %v698_v5 = vadd.f32 3.0, %v506_v63  ;;  %v793_v25 = vmax.f32 %v729_v1, 0.0  ;;  %v764_v9 = vmax.f32 %v700_v61, 0.0  ;;  %v730_v10 = vadd.f32 3.0, %v634_v49 }
 0x12b   : > { %v827_v6 = vmin.f32 %v763_v0, 6.0  ;;  %v859_v2 = vmin.f32 %v795_v54, 6.0  ;;  %v825_v14 = vmin.f32 %v761_v4, 6.0  ;;  %v796_v15 = vmax.f32 %v732_v24, 0.0 }
 0x12c   : > { %v762_v3 = vmax.f32 %v698_v5, 0.0  ;;  %v857_v17 = vmin.f32 %v793_v25, 6.0  ;;  %v828_v21 = vmin.f32 %v764_v9, 6.0  ;;  %v794_v22 = vmax.f32 %v730_v10, 0.0 }
 0x12d   : > { %v891_v16 = vmul.f32 %v827_v6, %v511_v53  ;;  %v923_v23 = vmul.f32 %v859_v2, %v639_v58  ;;  %v889_v26 = vmul.f32 %v825_v14, %v503_v19  ;;  %v860_v8 = vmin.f32 %v796_v15, 6.0 }
 0x12e   : > { %v826_v29 = vmin.f32 %v762_v3, 6.0  ;;  %v921_v34 = vmul.f32 %v857_v17, %v631_v52  ;;  %v892_v37 = vmul.f32 %v828_v21, %v514_v60  ;;  %v858_v45 = vmin.f32 %v794_v22, 6.0 }
 0x12f   : > { %v955_v32 = vmul.f32 0.16666667, %v891_v16  ;;  %v987_v46 = vmul.f32 0.16666667, %v923_v23  ;;  %v953_v30 = vmul.f32 0.16666667, %v889_v26  ;;  %v924_v47 = vmul.f32 %v860_v8, %v642_v57 }
 0x130   : > { %v890_v36 = vmul.f32 %v826_v29, %v506_v63  ;;  %v985_v51 = vmul.f32 0.16666667, %v921_v34  ;;  %v956_v12 = vmul.f32 0.16666667, %v892_v37  ;;  %v922_v53 = vmul.f32 %v858_v45, %v634_v49 }
 0x131   : > { %1020 = vst.msk [vmem:[%s1450_s4 + $0xb0] sm:$0xff] %vm997_vm3, %v955_v32  ;;  %v527_v55 = vadd.f32 %v1580_v33, %v1435_v42  ;;  %1052 = vst.msk [vmem:[%s1450_s4 + $0x1b0] sm:$0xff] %vm997_vm3, %v987_v46  ;;  %v988_v43 = vmul.f32 0.16666667, %v924_v47  ;;  %v655_v19 = vadd.f32 %v1586_v40, %v1435_v42  ;;  %v519_v59 = vadd.f32 %v1435_v42, %v1588_v44 }
 0x132   : > { %1018 = vst.msk [vmem:[%s1450_s4 + $0xa0] sm:$0xff] %vm997_vm3, %v953_v30  ;;  %v954_v58 = vmul.f32 0.16666667, %v890_v36  ;;  %1050 = vst.msk [vmem:[%s1450_s4 + $0x1a0] sm:$0xff] %vm997_vm3, %v985_v51  ;;  %v986_v48 = vmul.f32 0.16666667, %v922_v53  ;;  %v647_v33 = vadd.f32 %v1435_v42, %v1598_v35  ;;  %v530_v60 = vadd.f32 %v1600_v7, %v1435_v42 }
 0x133   : > { %1021 = vst.msk [vmem:[%s1450_s4 + $0xb8] sm:$0xff] %vm997_vm3, %v956_v12  ;;  %v703_v52 = vadd.f32 3.0, %v527_v55  ;;  %1053 = vst.msk [vmem:[%s1450_s4 + $0x1b8] sm:$0xff] %vm997_vm3, %v988_v43  ;;  %v735_v40 = vadd.f32 3.0, %v655_v19  ;;  %v701_v56 = vadd.f32 3.0, %v519_v59  ;;  %v658_v44 = vadd.f32 %v1610_v41, %v1435_v42 }
 0x134   : > { %1019 = vst.msk [vmem:[%s1450_s4 + $0xa8] sm:$0xff] %vm997_vm3, %v954_v58  ;;  %v522_v62 = vadd.f32 %v1435_v42, %v1612_v13  ;;  %1051 = vst.msk [vmem:[%s1450_s4 + $0x1a8] sm:$0xff] %vm997_vm3, %v986_v48  ;;  %v733_v63 = vadd.f32 3.0, %v647_v33  ;;  %v704_v35 = vadd.f32 3.0, %v530_v60  ;;  %v650_v7 = vadd.f32 %v1435_v42, %v1622_v18 }
 0x135   : > { %v767_v57 = vmax.f32 %v703_v52, 0.0  ;;  %v799_v0 = vmax.f32 %v735_v40, 0.0  ;;  %v765_v1 = vmax.f32 %v701_v56, 0.0  ;;  %v736_v61 = vadd.f32 3.0, %v658_v44 }
 0x136   : > { %v702_v49 = vadd.f32 3.0, %v522_v62  ;;  %v797_v4 = vmax.f32 %v733_v63, 0.0  ;;  %v768_v24 = vmax.f32 %v704_v35, 0.0  ;;  %v734_v5 = vadd.f32 3.0, %v650_v7 }
 0x137   : > { %v831_v54 = vmin.f32 %v767_v57, 6.0  ;;  %v863_v41 = vmin.f32 %v799_v0, 6.0  ;;  %v829_v6 = vmin.f32 %v765_v1, 6.0  ;;  %v800_v25 = vmax.f32 %v736_v61, 0.0 }
 0x138   : > { %v766_v13 = vmax.f32 %v702_v49, 0.0  ;;  %v861_v10 = vmin.f32 %v797_v4, 6.0  ;;  %v832_v2 = vmin.f32 %v768_v24, 6.0  ;;  %v798_v14 = vmax.f32 %v734_v5, 0.0 }
 0x139   : > { %v895_v9 = vmul.f32 %v831_v54, %v527_v55  ;;  %v927_v15 = vmul.f32 %v863_v41, %v655_v19  ;;  %v893_v3 = vmul.f32 %v829_v6, %v519_v59  ;;  %v864_v18 = vmin.f32 %v800_v25, 6.0 }
 0x13a   : > { %v830_v16 = vmin.f32 %v766_v13, 6.0  ;;  %v925_v21 = vmul.f32 %v861_v10, %v647_v33  ;;  %v896_v22 = vmul.f32 %v832_v2, %v530_v60  ;;  %v862_v23 = vmin.f32 %v798_v14, 6.0 }
 0x13b   : > { %v959_v17 = vmul.f32 0.16666667, %v895_v9  ;;  %v991_v26 = vmul.f32 0.16666667, %v927_v15  ;;  %v957_v8 = vmul.f32 0.16666667, %v893_v3  ;;  %v928_v29 = vmul.f32 %v864_v18, %v658_v44 }
 0x13c   : > { %v894_v32 = vmul.f32 %v830_v16, %v522_v62  ;;  %v989_v34 = vmul.f32 0.16666667, %v925_v21  ;;  %v960_v37 = vmul.f32 0.16666667, %v896_v22  ;;  %v926_v45 = vmul.f32 %v862_v23, %v650_v7 }
 0x13d   : > { %1024 = vst.msk [vmem:[%s1450_s4 + $0xd0] sm:$0xff] %vm997_vm3, %v959_v17  ;;  %v543_v46 = vadd.f32 %v1628_v11, %v1435_v42  ;;  %1056 = vst.msk [vmem:[%s1450_s4 + $0x1d0] sm:$0xff] %vm997_vm3, %v991_v26  ;;  %v992_v30 = vmul.f32 0.16666667, %v928_v29  ;;  %v671_v36 = vadd.f32 %v1630_v20, %v1435_v42  ;;  %v535_v51 = vadd.f32 %v1435_v42, %v1632_v31 }
 0x13e   : > { %1022 = vst.msk [vmem:[%s1450_s4 + $0xc0] sm:$0xff] %vm997_vm3, %v957_v8  ;;  %v958_v47 = vmul.f32 0.16666667, %v894_v32  ;;  %1054 = vst.msk [vmem:[%s1450_s4 + $0x1c0] sm:$0xff] %vm997_vm3, %v989_v34  ;;  %v990_v12 = vmul.f32 0.16666667, %v926_v45  ;;  %v663_v11 = vadd.f32 %v1435_v42, %v1634_v27  ;;  %v546_v55 = vadd.f32 %v1636_v28, %v1435_v42 }
 0x13f   : > { %1025 = vst.msk [vmem:[%s1450_s4 + $0xd8] sm:$0xff] %vm997_vm3, %v960_v37  ;;  %v707_v53 = vadd.f32 3.0, %v543_v46  ;;  %1057 = vst.msk [vmem:[%s1450_s4 + $0x1d8] sm:$0xff] %vm997_vm3, %v992_v30  ;;  %v739_v20 = vadd.f32 3.0, %v671_v36  ;;  %v705_v43 = vadd.f32 3.0, %v535_v51  ;;  %v674_v31 = vadd.f32 %v1638_v38, %v1435_v42 }
 0x140   : > { %1023 = vst.msk [vmem:[%s1450_s4 + $0xc8] sm:$0xff] %vm997_vm3, %v958_v47  ;;  %v538_v58 = vadd.f32 %v1435_v42, %v1640_v39  ;;  %1055 = vst.msk [vmem:[%s1450_s4 + $0x1c8] sm:$0xff] %vm997_vm3, %v990_v12  ;;  %v737_v59 = vadd.f32 3.0, %v663_v11  ;;  %v708_v27 = vadd.f32 3.0, %v546_v55  ;;  %v666_v28 = vadd.f32 %v1435_v42, %v1642_v50 }
 0x141   : > { %v771_v19 = vmax.f32 %v707_v53, 0.0  ;;  %v803_v48 = vmax.f32 %v739_v20, 0.0  ;;  %v769_v52 = vmax.f32 %v705_v43, 0.0  ;;  %v740_v33 = vadd.f32 3.0, %v674_v31 }
 0x142   : > { %v706_v60 = vadd.f32 3.0, %v538_v58  ;;  %v801_v56 = vmax.f32 %v737_v59, 0.0  ;;  %v772_v44 = vmax.f32 %v708_v27, 0.0  ;;  %v738_v62 = vadd.f32 3.0, %v666_v28 }
 0x143   : > { %v835_v40 = vmin.f32 %v771_v19, 6.0  ;;  %v867_v38 = vmin.f32 %v803_v48, 6.0  ;;  %v833_v57 = vmin.f32 %v769_v52, 6.0  ;;  %v804_v63 = vmax.f32 %v740_v33, 0.0 }
 0x144   : > { %v770_v39 = vmax.f32 %v706_v60, 0.0  ;;  %v865_v7 = vmin.f32 %v801_v56, 6.0  ;;  %v836_v0 = vmin.f32 %v772_v44, 6.0  ;;  %v802_v1 = vmax.f32 %v738_v62, 0.0 }
 0x145   : > { %v899_v35 = vmul.f32 %v835_v40, %v543_v46  ;;  %v931_v61 = vmul.f32 %v867_v38, %v671_v36  ;;  %v897_v42 = vmul.f32 %v833_v57, %v535_v51  ;;  %v868_v50 = vmin.f32 %v804_v63, 6.0 }
 0x146   : > { %v834_v49 = vmin.f32 %v770_v39, 6.0  ;;  %v929_v4 = vmul.f32 %v865_v7, %v663_v11  ;;  %v900_v24 = vmul.f32 %v836_v0, %v546_v55  ;;  %v866_v5 = vmin.f32 %v802_v1, 6.0 }
 0x147   : > { %v963_v54 = vmul.f32 0.16666667, %v899_v35  ;;  %v995_v41 = vmul.f32 0.16666667, %v931_v61  ;;  %v961_v6 = vmul.f32 0.16666667, %v897_v42  ;;  %v932_v25 = vmul.f32 %v868_v50, %v674_v31 }
 0x148   : > { %v898_v13 = vmul.f32 %v834_v49, %v538_v58  ;;  %v993_v9 = vmul.f32 0.16666667, %v929_v4  ;;  %v964_v10 = vmul.f32 0.16666667, %v900_v24  ;;  %v930_v2 = vmul.f32 %v866_v5, %v666_v28 }
 0x149   : > { %1028 = vst.msk [vmem:[%s1450_s4 + $0xf0] sm:$0xff] %vm997_vm3, %v963_v54  ;;  %1060 = vst.msk [vmem:[%s1450_s4 + $0x1f0] sm:$0xff] %vm997_vm3, %v995_v41  ;;  %v996_v14 = vmul.f32 0.16666667, %v932_v25 }
 0x14a   : > { %1026 = vst.msk [vmem:[%s1450_s4 + $0xe0] sm:$0xff] %vm997_vm3, %v961_v6  ;;  %v962_v15 = vmul.f32 0.16666667, %v898_v13  ;;  %1058 = vst.msk [vmem:[%s1450_s4 + $0x1e0] sm:$0xff] %vm997_vm3, %v993_v9  ;;  %v994_v3 = vmul.f32 0.16666667, %v930_v2 }
 0x14b   : > { %1029 = vst.msk [vmem:[%s1450_s4 + $0xf8] sm:$0xff] %vm997_vm3, %v964_v10  ;;  %1061 = vst.msk [vmem:[%s1450_s4 + $0x1f8] sm:$0xff] %vm997_vm3, %v996_v14 }
 0x14c   : > { %1027 = vst.msk [vmem:[%s1450_s4 + $0xe8] sm:$0xff] %vm997_vm3, %v962_v15  ;;  %1059 = vst.msk [vmem:[%s1450_s4 + $0x1e8] sm:$0xff] %vm997_vm3, %v994_v3 }
 0x14d PF: > { %s13_s12 = sadd.s32 1, %s1283_s12  }
 0x14e   : > { %p10_p4 = scmp.ge.s32.totalorder %s13_s12, 6  }
 0x150   :  { %12 = sbr.rel (!%p10_p4) target bundleno = 1 (0x1), region = 62 }

</bundles_post_ra>
